<compile_context>
chip_gen: v7x
topology: tpu7x:2x2x1
jax: 0.10.0
libtpu: 0.0.40
codegen_flags: <defaults>
</compile_context>

<pallas_src>
import functools
import math

import jax
import jax.numpy as jnp
from jax import lax
from jax.experimental import pallas as pl
from jax.experimental.pallas import tpu as pltpu


# ----------------------------------------------------------------------------
# Helpers
# ----------------------------------------------------------------------------
def _round_up(n, m):
    return ((n + m - 1) // m) * m


def _choose_batch_tile(B):
    """Pick a batch tile: multiple of 8, MXU/roofline-friendly, grid >= 2."""
    for tb in (512, 256, 128, 64, 32, 16, 8):
        if B >= 2 * tb and B % tb == 0:
            return tb
    return _round_up(B, 8)   # tiny batches: one (padded) tile


# ----------------------------------------------------------------------------
# Fused kernel: all encoder+decoder Linear+ReLU layers in one body
# ----------------------------------------------------------------------------
def _build_fused_kernel(n_layers):
    def kernel(*refs):
        # refs = (x_ref, w_0..w_{L-1} (bf16, (in,out)), b_0..b_{L-1} (f32, (1,out)), o_ref)
        x_ref = refs[0]
        w_refs = refs[1:1 + n_layers]
        b_refs = refs[1 + n_layers:1 + 2 * n_layers]
        o_ref = refs[1 + 2 * n_layers]

        x = x_ref[...]                                   # (TB, in) f32
        for l in range(n_layers):
            # Natural [M,K] x [K,N] dot, rhs contracts axis 0 -> no XLU transpose.
            y = lax.dot_general(
                x.astype(jnp.bfloat16), w_refs[l][...],
                dimension_numbers=(((1,), (0,)), ((), ())),
                preferred_element_type=jnp.float32,
            )
            # Bias add + ReLU in f32.
            x = jnp.maximum(y + b_refs[l][...], 0.0)
        o_ref[...] = x.astype(o_ref.dtype)

    return kernel


# ----------------------------------------------------------------------------
# Wrapper: single fused pallas_call for the whole forward pass
# ----------------------------------------------------------------------------
@functools.partial(jax.jit, static_argnames=("batch_tile",))
def fused_autoencoder(x, kernel_weights, biases, *, batch_tile=None):
    B, in_dim = x.shape
    n_layers = len(kernel_weights)
    out_dim = int(kernel_weights[-1].shape[-1])          # == sizes[0]

    TB = _choose_batch_tile(B) if batch_tile is None else int(batch_tile)
    Bp = _round_up(B, TB)
    if Bp != B:
        x = jnp.pad(x, ((0, Bp - B), (0, 0)))
    grid = (Bp // TB,)

    biases_2d = tuple(b.reshape(1, -1) for b in biases)

    in_specs = [pl.BlockSpec((TB, in_dim), lambda i: (i, 0))]
    for w in kernel_weights:                             # resident, full-array blocks
        in_specs.append(pl.BlockSpec(w.shape, lambda i: (0, 0)))
    for b in biases_2d:
        in_specs.append(pl.BlockSpec(b.shape, lambda i: (0, 0)))

    # Explicit VMEM budget: double-buffered x/out, (double-buffered) resident
    # weights/biases, plus chained activation temporaries (f32 + bf16 copies).
    widths = tuple(int(w.shape[-1]) for w in kernel_weights)
    io_bytes = 2 * TB * (in_dim + out_dim) * x.dtype.itemsize
    w_bytes = 2 * sum(math.prod(w.shape) * w.dtype.itemsize for w in kernel_weights)
    b_bytes = 2 * sum(math.prod(b.shape) * b.dtype.itemsize for b in biases_2d)
    act_bytes = TB * sum(widths) * (4 + 2)
    vmem_limit = int(1.5 * (io_bytes + w_bytes + b_bytes + act_bytes)) + (4 << 20)
    vmem_limit = max(16 << 20, min(vmem_limit, 48 << 20))   # headroom under v7x 64 MiB

    flops = 2 * Bp * sum(int(w.shape[0]) * int(w.shape[1]) for w in kernel_weights)
    bytes_accessed = (Bp * (in_dim + out_dim) * x.dtype.itemsize
                      + w_bytes // 2 + b_bytes // 2)

    out = pl.pallas_call(
        _build_fused_kernel(n_layers),
        out_shape=jax.ShapeDtypeStruct((Bp, out_dim), x.dtype),
        grid_spec=pltpu.PrefetchScalarGridSpec(
            num_scalar_prefetch=0,
            grid=grid,
            in_specs=in_specs,
            out_specs=pl.BlockSpec((TB, out_dim), lambda i: (i, 0)),
        ),
        compiler_params=pltpu.CompilerParams(
            dimension_semantics=("parallel",),           # batch tiles -> megacore on v7x
            vmem_limit_bytes=vmem_limit,
        ),
        cost_estimate=pl.CostEstimate(
            flops=flops, transcendentals=0, bytes_accessed=bytes_accessed),
    )(x, *kernel_weights, *biases_2d)

    return out[:B] if Bp != B else out


# ----------------------------------------------------------------------------
# Parameter construction (mirrors the PyTorch __init__ semantics)
# ----------------------------------------------------------------------------
def init_params(key, sizes, tied_weights):
    """Xavier-uniform weights (PyTorch (out, in) layout), uniform biases."""
    def xavier(k, out_f, in_f):
        limit = jnp.sqrt(6.0 / (in_f + out_f)).astype(jnp.float32)
        return jax.random.uniform(k, (out_f, in_f), jnp.float32, -limit, limit)

    enc_w, enc_b, dec_w, dec_b = [], [], [], []
    k = key
    for i in range(1, len(sizes)):
        k, kw, kb = jax.random.split(k, 3)
        enc_w.append(xavier(kw, sizes[i], sizes[i - 1]))
        enc_b.append(jax.random.uniform(kb, (sizes[i],), jnp.float32, -0.1, 0.1))
    for i in range(len(sizes) - 1, 0, -1):
        k, kw, kb = jax.random.split(k, 3)
        dec_w.append(xavier(kw, sizes[i - 1], sizes[i]))
        dec_b.append(jax.random.uniform(kb, (sizes[i - 1],), jnp.float32, -0.1, 0.1))

    if tied_weights:
        n = len(enc_w)
        for idx in range(n):
            dec_w[n - 1 - idx] = enc_w[idx].T
    return enc_w, enc_b, dec_w, dec_b


def build_kernel_weights(enc_w, dec_w):
    """(in, out)-layout bf16 weights, built once at init (no per-call transposes)."""
    return tuple(jnp.asarray(w.T, jnp.bfloat16) for w in (*enc_w, *dec_w))


# ----------------------------------------------------------------------------
# References
# ----------------------------------------------------------------------------
def autoencoder_ref_f32(x, enc_w, enc_b, dec_w, dec_b):
    """Pure-f32 reference in PyTorch layout: y = relu(x @ W.T + b) per layer."""
    for w, b in zip(enc_w, enc_b):
        x = jax.nn.relu(x @ w.T + b)
    for w, b in zip(dec_w, dec_b):
        x = jax.nn.relu(x @ w.T + b)
    return x


def autoencoder_ref_bf16(x, kernel_weights, biases):
    """Mirrors the in-kernel math: bf16 MXU operands, f32 accumulate/bias/ReLU."""
    for w, b in zip(kernel_weights, biases):
        y = lax.dot_general(x.astype(jnp.bfloat16), w,
                            dimension_numbers=(((1,), (0,)), ((), ())),
                            preferred_element_type=jnp.float32)
        x = jnp.maximum(y + b, 0.0)
    return x


if __name__ == "__main__":
    sizes = [256, 128, 64]        # input dim 256, bottleneck 64
    batch = 64
    tied_weights = True

    key = jax.random.PRNGKey(0)
    kx, kp = jax.random.split(key)
    x = jax.random.normal(kx, (batch, sizes[0]), jnp.float32)

    enc_w, enc_b, dec_w, dec_b = init_params(kp, sizes, tied_weights)
    kernel_weights = build_kernel_weights(enc_w, dec_w)   # tied decoder reuses enc weights
    biases = tuple(enc_b) + tuple(dec_b)

    # Auto tile: TB=32 -> grid=(2,), real pipelining + both v7x TCs busy.
    out = fused_autoencoder(x, kernel_weights, biases)
    out = jax.block_until_ready(out)

    ref_bf16 = autoencoder_ref_bf16(x, kernel_weights, biases)
    ref_f32 = autoencoder_ref_f32(x, enc_w, enc_b, dec_w, dec_b)

    assert out.shape == (batch, sizes[0])
    # Tight check against a reference mirroring the kernel's bf16 MXU math.
    assert jnp.allclose(out, ref_bf16, atol=5e-3, rtol=5e-3), "mismatch vs bf16 reference"
    # Loose sanity check against the full-f32 PyTorch-layout reference
    # (catches plumbing errors; bf16 operands introduce ~1% numeric drift).
    assert jnp.allclose(out, ref_f32, atol=0.2, rtol=0.2), "mismatch vs f32 reference"

    print("KERNEL_OK")
</pallas_src>

<mosaic_0001>
module attributes {stable_mosaic.version = 11 : i64} {
  func.func @kernel(%arg0: i32, %arg1: memref<32x256xf32, #tpu.memory_space<vmem>>, %arg2: memref<256x128xbf16, #tpu.memory_space<vmem>>, %arg3: memref<128x64xbf16, #tpu.memory_space<vmem>>, %arg4: memref<64x128xbf16, #tpu.memory_space<vmem>>, %arg5: memref<128x256xbf16, #tpu.memory_space<vmem>>, %arg6: memref<1x128xf32, #tpu.memory_space<vmem>>, %arg7: memref<1x64xf32, #tpu.memory_space<vmem>>, %arg8: memref<1x128xf32, #tpu.memory_space<vmem>>, %arg9: memref<1x256xf32, #tpu.memory_space<vmem>>, %arg10: memref<32x256xf32, #tpu.memory_space<vmem>>) attributes {dimension_semantics = [#tpu.dimension_semantics<parallel>], iteration_bounds = array<i64: 2>, scalar_prefetch = 0 : i64, scratch_operands = 0 : i64, tpu.core_type = #tpu.core_type<tc>, window_params = [{transform_indices = @transform_0, window_bounds = array<i64: 32, 256>}, {pipeline_mode = #tpu.pipeline_mode<synchronous>, transform_indices = @transform_1, window_bounds = array<i64: 256, 128>}, {pipeline_mode = #tpu.pipeline_mode<synchronous>, transform_indices = @transform_2, window_bounds = array<i64: 128, 64>}, {pipeline_mode = #tpu.pipeline_mode<synchronous>, transform_indices = @transform_3, window_bounds = array<i64: 64, 128>}, {pipeline_mode = #tpu.pipeline_mode<synchronous>, transform_indices = @transform_4, window_bounds = array<i64: 128, 256>}, {pipeline_mode = #tpu.pipeline_mode<synchronous>, transform_indices = @transform_5, window_bounds = array<i64: 1, 128>}, {pipeline_mode = #tpu.pipeline_mode<synchronous>, transform_indices = @transform_6, window_bounds = array<i64: 1, 64>}, {pipeline_mode = #tpu.pipeline_mode<synchronous>, transform_indices = @transform_7, window_bounds = array<i64: 1, 128>}, {pipeline_mode = #tpu.pipeline_mode<synchronous>, transform_indices = @transform_8, window_bounds = array<i64: 1, 256>}, {transform_indices = @transform_9, window_bounds = array<i64: 32, 256>}]} {
    %c0 = arith.constant 0 : index
    %c0_0 = arith.constant 0 : index
    %0 = vector.load %arg1[%c0, %c0_0] : memref<32x256xf32, #tpu.memory_space<vmem>>, vector<32x256xf32>
    %1 = arith.truncf %0 : vector<32x256xf32> to vector<32x256xbf16>
    %c0_1 = arith.constant 0 : index
    %c0_2 = arith.constant 0 : index
    %2 = vector.load %arg2[%c0_1, %c0_2] : memref<256x128xbf16, #tpu.memory_space<vmem>>, vector<256x128xbf16>
    %cst = arith.constant dense<0.000000e+00> : vector<32x128xf32>
    %3 = tpu.matmul %1, %2, %cst {dimension_numbers = #tpu.dot_dimension_numbers<[1], [0], [0], [1], [0, 0, 1, 1], [], []>} : vector<32x256xbf16>, vector<256x128xbf16>, vector<32x128xf32> -> vector<32x128xf32>
    %c0_3 = arith.constant 0 : index
    %c0_4 = arith.constant 0 : index
    %4 = vector.load %arg6[%c0_3, %c0_4] : memref<1x128xf32, #tpu.memory_space<vmem>>, vector<1x128xf32>
    %5 = vector.broadcast %4 : vector<1x128xf32> to vector<32x128xf32>
    %6 = arith.addf %3, %5 : vector<32x128xf32>
    %cst_5 = arith.constant 0.000000e+00 : f32
    %7 = vector.broadcast %cst_5 : f32 to vector<32x128xf32>
    %8 = arith.maximumf %6, %7 : vector<32x128xf32>
    %9 = arith.truncf %8 : vector<32x128xf32> to vector<32x128xbf16>
    %c0_6 = arith.constant 0 : index
    %c0_7 = arith.constant 0 : index
    %10 = vector.load %arg3[%c0_6, %c0_7] : memref<128x64xbf16, #tpu.memory_space<vmem>>, vector<128x64xbf16>
    %cst_8 = arith.constant dense<0.000000e+00> : vector<32x64xf32>
    %11 = tpu.matmul %9, %10, %cst_8 {dimension_numbers = #tpu.dot_dimension_numbers<[1], [0], [0], [1], [0, 0, 1, 1], [], []>} : vector<32x128xbf16>, vector<128x64xbf16>, vector<32x64xf32> -> vector<32x64xf32>
    %c0_9 = arith.constant 0 : index
    %c0_10 = arith.constant 0 : index
    %12 = vector.load %arg7[%c0_9, %c0_10] : memref<1x64xf32, #tpu.memory_space<vmem>>, vector<1x64xf32>
    %13 = vector.broadcast %12 : vector<1x64xf32> to vector<32x64xf32>
    %14 = arith.addf %11, %13 : vector<32x64xf32>
    %cst_11 = arith.constant 0.000000e+00 : f32
    %15 = vector.broadcast %cst_11 : f32 to vector<32x64xf32>
    %16 = arith.maximumf %14, %15 : vector<32x64xf32>
    %17 = arith.truncf %16 : vector<32x64xf32> to vector<32x64xbf16>
    %c0_12 = arith.constant 0 : index
    %c0_13 = arith.constant 0 : index
    %18 = vector.load %arg4[%c0_12, %c0_13] : memref<64x128xbf16, #tpu.memory_space<vmem>>, vector<64x128xbf16>
    %cst_14 = arith.constant dense<0.000000e+00> : vector<32x128xf32>
    %19 = tpu.matmul %17, %18, %cst_14 {dimension_numbers = #tpu.dot_dimension_numbers<[1], [0], [0], [1], [0, 0, 1, 1], [], []>} : vector<32x64xbf16>, vector<64x128xbf16>, vector<32x128xf32> -> vector<32x128xf32>
    %c0_15 = arith.constant 0 : index
    %c0_16 = arith.constant 0 : index
    %20 = vector.load %arg8[%c0_15, %c0_16] : memref<1x128xf32, #tpu.memory_space<vmem>>, vector<1x128xf32>
    %21 = vector.broadcast %20 : vector<1x128xf32> to vector<32x128xf32>
    %22 = arith.addf %19, %21 : vector<32x128xf32>
    %cst_17 = arith.constant 0.000000e+00 : f32
    %23 = vector.broadcast %cst_17 : f32 to vector<32x128xf32>
    %24 = arith.maximumf %22, %23 : vector<32x128xf32>
    %25 = arith.truncf %24 : vector<32x128xf32> to vector<32x128xbf16>
    %c0_18 = arith.constant 0 : index
    %c0_19 = arith.constant 0 : index
    %26 = vector.load %arg5[%c0_18, %c0_19] : memref<128x256xbf16, #tpu.memory_space<vmem>>, vector<128x256xbf16>
    %cst_20 = arith.constant dense<0.000000e+00> : vector<32x256xf32>
    %27 = tpu.matmul %25, %26, %cst_20 {dimension_numbers = #tpu.dot_dimension_numbers<[1], [0], [0], [1], [0, 0, 1, 1], [], []>} : vector<32x128xbf16>, vector<128x256xbf16>, vector<32x256xf32> -> vector<32x256xf32>
    %c0_21 = arith.constant 0 : index
    %c0_22 = arith.constant 0 : index
    %28 = vector.load %arg9[%c0_21, %c0_22] : memref<1x256xf32, #tpu.memory_space<vmem>>, vector<1x256xf32>
    %29 = vector.broadcast %28 : vector<1x256xf32> to vector<32x256xf32>
    %30 = arith.addf %27, %29 : vector<32x256xf32>
    %cst_23 = arith.constant 0.000000e+00 : f32
    %31 = vector.broadcast %cst_23 : f32 to vector<32x256xf32>
    %32 = arith.maximumf %30, %31 : vector<32x256xf32>
    %c0_24 = arith.constant 0 : index
    %c0_25 = arith.constant 0 : index
    %33 = vector.load %arg10[%c0_24, %c0_25] : memref<32x256xf32, #tpu.memory_space<vmem>>, vector<32x256xf32>
    tpu.vector_store %arg10[%c0_24, %c0_25], %32 {strides = array<i32>} : memref<32x256xf32, #tpu.memory_space<vmem>>, vector<32x256xf32>,
    return
  }
  func.func @transform_0(%arg0: i32) -> (i32, i32) {
    %c0_i32 = arith.constant 0 : i32
    %c0_i32_0 = arith.constant 0 : i32
    return %arg0, %c0_i32 : i32, i32
  }
  func.func @transform_1(%arg0: i32) -> (i32, i32) {
    %c0_i32 = arith.constant 0 : i32
    %c0_i32_0 = arith.constant 0 : i32
    %c0_i32_1 = arith.constant 0 : i32
    return %c0_i32, %c0_i32_0 : i32, i32
  }
  func.func @transform_2(%arg0: i32) -> (i32, i32) {
    %c0_i32 = arith.constant 0 : i32
    %c0_i32_0 = arith.constant 0 : i32
    %c0_i32_1 = arith.constant 0 : i32
    return %c0_i32, %c0_i32_0 : i32, i32
  }
  func.func @transform_3(%arg0: i32) -> (i32, i32) {
    %c0_i32 = arith.constant 0 : i32
    %c0_i32_0 = arith.constant 0 : i32
    %c0_i32_1 = arith.constant 0 : i32
    return %c0_i32, %c0_i32_0 : i32, i32
  }
  func.func @transform_4(%arg0: i32) -> (i32, i32) {
    %c0_i32 = arith.constant 0 : i32
    %c0_i32_0 = arith.constant 0 : i32
    %c0_i32_1 = arith.constant 0 : i32
    return %c0_i32, %c0_i32_0 : i32, i32
  }
  func.func @transform_5(%arg0: i32) -> (i32, i32) {
    %c0_i32 = arith.constant 0 : i32
    %c0_i32_0 = arith.constant 0 : i32
    %c0_i32_1 = arith.constant 0 : i32
    return %c0_i32, %c0_i32_0 : i32, i32
  }
  func.func @transform_6(%arg0: i32) -> (i32, i32) {
    %c0_i32 = arith.constant 0 : i32
    %c0_i32_0 = arith.constant 0 : i32
    %c0_i32_1 = arith.constant 0 : i32
    return %c0_i32, %c0_i32_0 : i32, i32
  }
  func.func @transform_7(%arg0: i32) -> (i32, i32) {
    %c0_i32 = arith.constant 0 : i32
    %c0_i32_0 = arith.constant 0 : i32
    %c0_i32_1 = arith.constant 0 : i32
    return %c0_i32, %c0_i32_0 : i32, i32
  }
  func.func @transform_8(%arg0: i32) -> (i32, i32) {
    %c0_i32 = arith.constant 0 : i32
    %c0_i32_0 = arith.constant 0 : i32
    %c0_i32_1 = arith.constant 0 : i32
    return %c0_i32, %c0_i32_0 : i32, i32
  }
  func.func @transform_9(%arg0: i32) -> (i32, i32) {
    %c0_i32 = arith.constant 0 : i32
    %c0_i32_0 = arith.constant 0 : i32
    return %arg0, %c0_i32 : i32, i32
  }
}

</mosaic_0001>

<bundles_post_ra>
// kernel: fused_autoencoder.1
= control target key start
LH: loop header
LB: loop body
LE: loop exit
PB: predicated region body
PF: predicated region fallthrough
CT: control target
= control target key end

     0   :  { %14 = vsyncpa [#allocation3], 0  ;;  %s1891_s0 = inlined_call_operand.hbm [shape: f32[64,256], index: 0, kind: input, shape index: {}]   ;;  %s1892_s1 = inlined_call_operand.hbm [shape: bf16[256,128], index: 1, kind: input, shape index: {}]   ;;  %s1893_s2 = inlined_call_operand.vmem [shape: bf16[128,64], index: 2, kind: input, shape index: {}]   ;;  %s1894_s3 = inlined_call_operand.vmem [shape: bf16[64,128], index: 3, kind: input, shape index: {}]   ;;  %s1895_s4 = inlined_call_operand.hbm [shape: bf16[128,256], index: 4, kind: input, shape index: {}]   ;;  %s1896_s5 = inlined_call_operand.vmem [shape: f32[1,128], index: 5, kind: input, shape index: {}]   ;;  %s1897_s6 = inlined_call_operand.vmem [shape: f32[1,64], index: 6, kind: input, shape index: {}]   ;;  %s1898_s7 = inlined_call_operand.vmem [shape: f32[1,128], index: 7, kind: input, shape index: {}]   ;;  %s1899_s8 = inlined_call_operand.vmem [shape: f32[1,256], index: 8, kind: input, shape index: {}]   ;;  %s1900_s9 = inlined_call_operand.hbm [shape: f32[64,256], index: 9, kind: output, shape index: {}]  }
   0x1   :  { %16 = vsyncpa [#allocation3 + $0x1], 0 }
   0x2   :  { %17 = vsyncpa [#allocation6], 0 }
   0x3   :  { %18 = vsyncpa [#allocation4], 0 }
   0x4   :  { %20 = vsyncpa [#allocation4 + $0x1], 0  ;;  %s1595_s30 = smov 0   ;;  %s1597_s10 = smov 0  }
   0x5   :  { %s1599_s11 = smov 0   ;;  %s1601_s12 = smov 0  }
   0x6 LB: > { %s1616_s13 = sadd.s32 4294967295, %s1530_s12   ;;  %s1097_s14 = sadd.s32 4294967294, %s1530_s12   ;;  %s1530_s12 = sphi %s1601_s12, %s1923_s12   ;;  %s1526_s11 = sphi %s1599_s11, %s1922_s11   ;;  %s1522_s10 = sphi %s1597_s10, %s1921_s10   ;;  %s1518_s30 = sphi %s1595_s30, %s1920_s30  }
   0x7   : > { %p46_p0 = scmp.ne.s32.totalorder %s1522_s10, %s1518_s30  ;;  %p1901_p1 = scmp.eq.s32.totalorder %s1616_s13, 0 }
   0x8   : > { %p244_p3 = scmp.eq.s32.totalorder %s1097_s14, 1  ;;  %p1098_p5 = scmp.ge.s32.totalorder %s1530_s12, 1 }
   0x9   : > { %p1625_p4 = por %p1901_p1, %p46_p0  ;;  %p251_p7 = scmp.lt.s32.totalorder %s1530_s12, 3 }
   0xa   : > { %p1630_p6 = por %p244_p3, %p46_p0  ;;  %s1532_s18 = smov [#allocation5]  }
   0xb   : > { %s1905_s15 = scalar_select %p1625_p4, 1, 0 }
   0xc   : > { %s1906_s16 = scalar_select %p1630_p6, 1, 0 }
   0xd   : > { %p1635_p8 = pnand %p1098_p5, %p251_p7  ;;  %s263_s19 = sshll.u32 %s1532_s18, 4  ;;  %s1639_s19 = int_to_ptr.vmem [resolvable:$true] %s263_s19 }
   0xe   : > { %1907 = sst [smem:[#allocation12_spill]] %s1906_s16  ;;  %s1533_s21 = smov [#allocation7]  }
   0xf   : > { %p1258_p9 = pneg %p1635_p8  ;;  %s282_s22 = sshll.u32 %s1533_s21, 4  ;;  %s1650_s22 = int_to_ptr.vmem [resolvable:$true] %s282_s22 }
  0x10   : > { %s1374_s25 = scalar_lea.hbm %s1892_s1, 2048 }
  0x11   : > { %p1646_p11 = pnand %p1258_p9, %p1901_p1  ;;  %p1375_p12 = scmp.ne.s32.totalorder %s1892_s1, %s1374_s25 }
  0x12   : > { %p1381_p5 = scmp.lt.u32.totalorder %s1374_s25, %s1892_s1 }
  0x13   : > { %p1376_p13 = pneg %p1646_p11 }
  0x15   : > { %p1377_p0 = pnand %p1376_p13, %p1375_p12 }
  0x17   : > { %p1378_p3 = pneg %p1377_p0 }
  0x19   : > { %p1383_p7 = pnand %p1381_p5, %p1378_p3 }
  0x1b   : > { %1386 = shalt.err (!%p1383_p7)
}
  0x1c   : > { %s1387_s14 = scalar_lea.vmem %s1639_s19, 2048  ;;  %p1395_p2 = scmp.lt.s32.totalorder %s1639_s19, %s1639_s19 }
  0x1d   : > { %p1388_p9 = scmp.ne.s32.totalorder %s1639_s19, %s1387_s14  ;;  %p1396_p12 = scmp.lt.s32.totalorder %s1387_s14, %s1387_s14 }
  0x1f   : > { %p1390_p10 = pnand %p1388_p9, %p1376_p13  ;;  %p1397_p0 = por %p1396_p12, %p1395_p2 }
  0x21   : > { %p1391_p1 = pneg %p1390_p10 }
  0x23   : > { %p1398_p6 = pnand %p1397_p0, %p1391_p1 }
  0x25   : > { %1401 = shalt.err (!%p1398_p6)
}
  0x26   : > { %s1534_s18 = smov 64   ;;  %s1535_s21 = smov 4  }
  0x27   : > { %1261 = dma.hbm_to_vmem [thread:$0]  (!%p1646_p11), %s1892_s1, 2048, %s1639_s19, [#allocation6], %s1534_s18, %s1534_s18, %s1535_s21  }
  0x28   : > { %s1402_s27 = scalar_lea.hbm %s1895_s4, 2048 }
  0x29   : > { %p1403_p2 = scmp.ne.s32.totalorder %s1895_s4, %s1402_s27  ;;  %p1409_p10 = scmp.lt.u32.totalorder %s1402_s27, %s1895_s4 }
  0x2b   : > { %p1405_p1 = pnand %p1403_p2, %p1376_p13 }
  0x2d   : > { %p1406_p6 = pneg %p1405_p1 }
  0x2f   : > { %p1411_p3 = pnand %p1409_p10, %p1406_p6 }
  0x31   : > { %1414 = shalt.err (!%p1411_p3)
}
  0x32   : > { %s1415_s19 = scalar_lea.vmem %s1650_s22, 2048  ;;  %p1423_p12 = scmp.lt.s32.totalorder %s1650_s22, %s1650_s22 }
  0x33   : > { %p1416_p5 = scmp.ne.s32.totalorder %s1650_s22, %s1415_s19  ;;  %p1424_p0 = scmp.lt.s32.totalorder %s1415_s19, %s1415_s19 }
  0x35   : > { %p1418_p7 = pnand %p1416_p5, %p1376_p13  ;;  %p1425_p2 = por %p1424_p0, %p1423_p12 }
  0x37   : > { %p1419_p9 = pneg %p1418_p7 }
  0x39   : > { %p1426_p1 = pnand %p1425_p2, %p1419_p9 }
  0x3b   : > { %1429 = shalt.err (!%p1426_p1)
}
  0x3c   : > { %s1536_s16 = smov 128   ;;  %s1537_s18 = smov 8  }
  0x3d   : > { %1264 = dma.hbm_to_vmem [thread:$0]  (!%p1646_p11), %s1895_s4, 2048, %s1650_s22, [#allocation6], %s1536_s16, %s1536_s16, %s1537_s18  }
  0x3e   : > { %s1705_s24 = sadd.s32 1, %s1530_s12   ;;  %s33_s26 = sadd.s32 1, %s1526_s11 }
  0x3f   : > { %s30_s25 = ssub.s32 %s1530_s12, %s1705_s24  ;;  %p40_p6 = scmp.ne.s32.totalorder %s1526_s11, %s1522_s10 }
  0x40   : > { %p31_p13 = scmp.eq.s32.totalorder %s30_s25, 0  ;;  %p41_p10 = scmp.eq.s32.totalorder %s1530_s12, 0 }
  0x41   : > { %p1910_p5 = scmp.eq.s32.totalorder %s1616_s13, 1  ;;  %p1275_p9 = scmp.lt.s32.totalorder %s1530_s12, 2 }
  0x42   : > { %s1714_s27 = scalar_select %p31_p13, %s1526_s11, %s33_s26  }
  0x43   : > { %p42_p3 = por %p41_p10, %p40_p6  ;;  %p1718_p7 = por %p1910_p5, %p40_p6 }
  0x44   : > { %s308_s20 = sand.u32 1, %s1526_s11   ;;  %s1167_s22 = sshll.u32 %s1530_s12, 10 }
  0x45   : > { %s1911_s28 = scalar_select %p1718_p7, 1, 0 }
  0x46   : > { %s1102_s29 = sshll.u32 %s308_s20, 6  ;;  %s1728_s16 = scalar_lea.hbm %s1891_s0, %s1167_s22 }
  0x47   : > { %s312_s18 = scalar_lea.vmem [#allocation2], %s1102_s29  ;;  %p1732_p11 = pnand %p1275_p9, %p42_p3 }
  0x48   : > { %s320_s21 = sshll.u32 %s312_s18, 4  ;;  %s1736_s25 = scalar_lea.sflag [#allocation3], %s308_s20  ;;  %s1730_s21 = int_to_ptr.vmem [resolvable:$true] %s320_s21 }
  0x49   : > { %s1430_s26 = scalar_lea.hbm %s1728_s16, 1024  ;;  %p1432_p0 = pneg %p1732_p11 }
  0x4a   : > { %p1431_p12 = scmp.ne.s32.totalorder %s1728_s16, %s1430_s26  ;;  %s1435_s14 = scalar_lea.hbm %s1891_s0, 2048 }
  0x4b   : > { %p1436_p13 = scmp.lt.u32.totalorder %s1728_s16, %s1891_s0  ;;  %p1437_p6 = scmp.lt.u32.totalorder %s1435_s14, %s1430_s26 }
  0x4c   : > { %p1433_p2 = pnand %p1432_p0, %p1431_p12  ;;  %p1439_p3 = scmp.lt.u32.totalorder %s1430_s26, %s1728_s16 }
  0x4d   : > { %p1438_p10 = por %p1437_p6, %p1436_p13 }
  0x4e   : > { %p1434_p1 = pneg %p1433_p2 }
  0x4f   : > { %p1440_p5 = por %p1439_p3, %p1438_p10 }
  0x51   : > { %p1441_p9 = pnand %p1440_p5, %p1434_p1 }
  0x53   : > { %1444 = shalt.err (!%p1441_p9)
}
  0x54   : > { %s1445_s20 = scalar_lea.vmem %s1730_s21, 1024  ;;  %s1538_s29 = smov [#allocation2]  }
  0x55   : > { %p1446_p12 = scmp.ne.s32.totalorder %s1730_s21, %s1445_s20  ;;  %s1450_s22 = sshll.u32 %s1538_s29, 4  ;;  %s1451_s22 = int_to_ptr.vmem [resolvable:$false] %s1450_s22 }
  0x56   : > { %s1452_s19 = scalar_lea.vmem %s1451_s22, 2048  ;;  %p1453_p4 = scmp.lt.s32.totalorder %s1730_s21, %s1451_s22 }
  0x57   : > { %p1448_p2 = pnand %p1446_p12, %p1432_p0  ;;  %p1454_p13 = scmp.lt.s32.totalorder %s1452_s19, %s1445_s20 }
  0x59   : > { %p1449_p7 = pneg %p1448_p2  ;;  %p1455_p6 = por %p1454_p13, %p1453_p4 }
  0x5b   : > { %p1456_p10 = pnand %p1455_p6, %p1449_p7 }
  0x5d   : > { %1459 = shalt.err (!%p1456_p10)
}
  0x5e   : > { %s1539_s26 = smov 256   ;;  %s1540_s14 = smov 16  }
  0x5f   : > { %1268 = dma.hbm_to_vmem [thread:$0]  (!%p1732_p11), %s1728_s16, 1024, %s1730_s21, %s1736_s25, %s1539_s26, %s1539_s26, %s1540_s14  }
  0x60   : > { %332 = sbr.rel (%p1635_p8) target bundleno = 1056 (0x420), region = 56  ;;  %s1767_s18 = sand.u32 (!%p1635_p8), 1, %s1522_s10  }
  0x61   : > { %s1107_s20 = sshll.u32 (!%p1635_p8), %s1767_s18, 6  ;;  %s335_s29 = scalar_lea.sflag (!%p1635_p8), [#allocation3], %s1767_s18 }
  0x62   : > { %s1773_s22 = scalar_lea.vmem (!%p1635_p8), [#allocation2], %s1107_s20  ;;  %p1913_p4 = scmp.ne.s32.totalorder (!%p1635_p8), %s1905_s15, 0 }
  0x67   : > { %1505 = dma.done.wait (%p1913_p4), %s335_s29, 1024  }
  0x68   : > { %1507 = vsyncadd (%p1913_p4), %s335_s29, 4294966272  ;;  %p1914_p7 = scmp.eq.s32.totalorder %s1616_s13, 0 }
  0x6a   : > { %1509 = dma.done.wait (%p1914_p7), [#allocation6], 4096   ;;  %p1915_p8 = pmov %p1914_p7 }
  0x6b   : > { %v1322_v0 = vld [vmem:[#allocation5 + $0x40] sm:$0xff]   ;;  %v1324_v2 = vld [vmem:[#allocation5 + $0x48] sm:$0xff]   ;;  %v1326_v4 = vld [vmem:[#allocation5 + $0x50] sm:$0xff]   ;;  %vm751_vm0 = vcmask 523264   ;;  %s380_s15 = scalar_lea.vmem [#allocation8], %s1107_s20  ;;  %p1916_p0 = scmp.ne.s32.totalorder %s1911_s28, 0 }
  0x6c   : > { %1511 = vsyncadd (%p1915_p8), [#allocation6], 4294963200  ;;  %v1323_v1 = vld [vmem:[#allocation5] sm:$0xff]   ;;  %1170 = vmatprep.subr.bf16.mxu0 %v1322_v0  ;;  %v1325_v3 = vld [vmem:[#allocation5 + $0x8] sm:$0xff]   ;;  %s1005_s17 = sshll.u32 %s380_s15, 4  ;;  %s1542_s25 = smov [#allocation8]   ;;  %s1842_s17 = int_to_ptr.vmem [resolvable:$true] %s1005_s17 }
  0x6d   : > { %1171 = vmatpush3.bf16.msra.mxu0 %v1323_v1  ;;  %v1327_v5 = vld [vmem:[#allocation5 + $0x10] sm:$0xff]   ;;  %v1328_v6 = vld [vmem:[#allocation5 + $0x58] sm:$0xff]   ;;  %v1330_v8 = vld [vmem:[#allocation5 + $0x60] sm:$0xff]   ;;  %s1460_s23 = scalar_lea.vmem %s1842_s17, 1024  ;;  %s1464_s19 = sshll.u32 %s1542_s25, 4  ;;  %s1465_s19 = int_to_ptr.vmem [resolvable:$false] %s1464_s19 }
  0x6e   : > { %1172 = vmatprep.subr.bf16.mxu0 %v1324_v2  ;;  %v1329_v7 = vld [vmem:[#allocation5 + $0x18] sm:$0xff]   ;;  %v1331_v9 = vld [vmem:[#allocation5 + $0x20] sm:$0xff]   ;;  %v1332_v10 = vld [vmem:[#allocation5 + $0x68] sm:$0xff]   ;;  %p1461_p11 = scmp.ne.s32.totalorder %s1842_s17, %s1460_s23  ;;  %s1466_s26 = scalar_lea.vmem %s1465_s19, 2048 }
  0x6f   : > { %v385_v11 = vld [vmem:[%s1773_s22 + $0x8] sm:$0xff]  ;;  %v387_v12 = vld [vmem:[%s1773_s22 + $0x18] sm:$0xff]  ;;  %v1334_v15 = vld [vmem:[#allocation5 + $0x70] sm:$0xff]   ;;  %p1467_p5 = scmp.lt.s32.totalorder %s1842_s17, %s1465_s19  ;;  %p1468_p9 = scmp.lt.s32.totalorder %s1466_s26, %s1460_s23 }
  0x70   : > { %v393_v13 = vpack.c.bf16 %v387_v12, %v385_v11  ;;  %v1333_v14 = vld [vmem:[#allocation5 + $0x28] sm:$0xff]   ;;  %v1338_v16 = vld [vmem:[%s1893_s2] sm:$0xff]   ;;  %v1335_v18 = vld [vmem:[#allocation5 + $0x30] sm:$0xff]   ;;  %p1462_p1 = pnand %p1461_p11, %p1916_p0 }
  0x71   : > { %1173 = vmatpush3.bf16.msra.mxu0 %v1325_v3  ;;  %v1339_v17 = vld [vmem:[%s1893_s2 + $0x8] sm:$0xff]   ;;  %1214 = vmatprep.subr.bf16.mxu1 %v1338_v16  ;;  %v1340_v19 = vld [vmem:[%s1893_s2 + $0x10] sm:$0xff]   ;;  %v1336_v20 = vld [vmem:[#allocation5 + $0x78] sm:$0xff]   ;;  %p1469_p12 = por %p1468_p9, %p1467_p5 }
  0x72   : > { %1174 = vmatprep.subr.bf16.mxu0 %v1326_v4  ;;  %563 = vmatprep.mubr.bf16.mxu0 %v393_v13  ;;  %v1337_v21 = vld [vmem:[#allocation5 + $0x38] sm:$0xff]   ;;  %v384_v22 = vld [vmem:[%s1773_s22] sm:$0xff]  ;;  %v386_v23 = vld [vmem:[%s1773_s22 + $0x10] sm:$0xff]  ;;  %p1463_p3 = pneg %p1462_p1 }
  0x73   : > { %1215 = vmatpush3.bf16.msra.mxu1 %v1338_v16  ;;  %v389_v24 = vld [vmem:[%s1773_s22 + $0x28] sm:$0xff]  ;;  %v391_v25 = vld [vmem:[%s1773_s22 + $0x38] sm:$0xff]  ;;  %v392_v26 = vpack.c.bf16 %v386_v23, %v384_v22  ;;  %v388_v28 = vld [vmem:[%s1773_s22 + $0x20] sm:$0xff] }
  0x74   : > { %1216 = vmatprep.subr.bf16.mxu1 %v1339_v17  ;;  %v395_v27 = vpack.c.bf16 %v391_v25, %v389_v24  ;;  %v390_v29 = vld [vmem:[%s1773_s22 + $0x30] sm:$0xff]  ;;  %v1341_v31 = vld [vmem:[%s1893_s2 + $0x18] sm:$0xff]   ;;  %v1342_v32 = vld [vmem:[%s1893_s2 + $0x20] sm:$0xff]   ;;  %s1169_s22 = sshll.u32 %s1616_s13, 10  ;;  %s991_s13 = scalar_lea.sflag [#allocation4], %s1767_s18 }
  0x75   : > { %1175 = vmatpush3.bf16.msra.mxu0 %v1327_v5  ;;  %v394_v30 = vpack.c.bf16 %v390_v29, %v388_v28  ;;  %v1343_v33 = vld [vmem:[%s1893_s2 + $0x28] sm:$0xff]   ;;  %v1344_v34 = vld [vmem:[%s1893_s2 + $0x30] sm:$0xff]   ;;  %v1345_v35 = vld [vmem:[%s1893_s2 + $0x38] sm:$0xff]   ;;  %s1847_s21 = scalar_lea.hbm %s1900_s9, %s1169_s22  ;;  %p1470_p2 = pnand %p1469_p12, %p1463_p3 }
  0x76   : > { %1176 = vmatprep.subr.bf16.mxu0 %v1328_v6  ;;  %v1346_v36 = vld [vmem:[%s1894_s3] sm:$0xff]   ;;  %v1347_v37 = vld [vmem:[%s1894_s3 + $0x8] sm:$0xff]   ;;  %v1348_v61 = vld [vmem:[%s1894_s3 + $0x10] sm:$0xff]  }
  0x77   : > { %1217 = vmatpush3.bf16.msra.mxu1 %v1339_v17  ;;  %v1111_v40 = vld [vmem:[%s1896_s5] ss:$0 sm:$0xff]  ;;  %v1349_v62 = vld [vmem:[%s1894_s3 + $0x18] sm:$0xff]   ;;  %v1352_v0 = vld [vmem:[#allocation7 + $0x4] ss:$8 sps:$4 sm:$0xff]  }
  0x78   : > { %1218 = vmatprep.subr.bf16.mxu1 %v1340_v19  ;;  %v1350_v63 = vld [vmem:[#allocation7] ss:$8 sps:$4 sm:$0xff]   ;;  %v1355_v1 = vld [vmem:[#allocation7 + $0x14] ss:$8 sps:$4 sm:$0xff]   ;;  %v1353_v2 = vld [vmem:[#allocation7 + $0x10] ss:$8 sps:$4 sm:$0xff]  }
  0x79   : > { %1177 = vmatpush3.bf16.msra.mxu0 %v1329_v7  ;;  %v1358_v3 = vld [vmem:[#allocation7 + $0x24] ss:$8 sps:$4 sm:$0xff]   ;;  %v1356_v4 = vld [vmem:[#allocation7 + $0x20] ss:$8 sps:$4 sm:$0xff]   ;;  %v1361_v5 = vld [vmem:[#allocation7 + $0x34] ss:$8 sps:$4 sm:$0xff]  }
  0x7a   : > { %1178 = vmatprep.subr.bf16.mxu0 %v1330_v8  ;;  %v1359_v6 = vld [vmem:[#allocation7 + $0x30] ss:$8 sps:$4 sm:$0xff]   ;;  %v1364_v7 = vld [vmem:[#allocation7 + $0x44] ss:$8 sps:$4 sm:$0xff]   ;;  %v1362_v8 = vld [vmem:[#allocation7 + $0x40] ss:$8 sps:$4 sm:$0xff]  }
  0x7b   : > { %1219 = vmatpush3.bf16.msra.mxu1 %v1340_v19  ;;  %v1128_v11 = vld [vmem:[%s1897_s6] ss:$0 sm:$0xff]  ;;  %v1373_v28 = vld [vmem:[#allocation7 + $0x74] ss:$8 sps:$4 sm:$0xff]   ;;  %v1371_v29 = vld [vmem:[#allocation7 + $0x70] ss:$8 sps:$4 sm:$0xff]  }
  0x7c   : > { %1220 = vmatprep.subr.bf16.mxu1 %v1341_v31 }
  0x7d   : > { %1179 = vmatpush3.bf16.msra.mxu0 %v1331_v9  ;;  %v1367_v9 = vld [vmem:[#allocation7 + $0x54] ss:$8 sps:$4 sm:$0xff]  }
  0x7e   : > { %1180 = vmatprep.subr.bf16.mxu0 %v1332_v10  ;;  %v1365_v10 = vld [vmem:[#allocation7 + $0x50] ss:$8 sps:$4 sm:$0xff]  }
  0x7f   : > { %1221 = vmatpush3.bf16.msra.mxu1 %v1341_v31  ;;  %v1137_v31 = vld [vmem:[%s1898_s7] ss:$0 sm:$0xff] }
  0x80   : > { %1222 = vmatprep.subr.bf16.mxu1 %v1342_v32 }
  0x81   : > { %1181 = vmatpush3.bf16.msra.mxu0 %v1333_v14 }
  0x82   : > { %1182 = vmatprep.subr.bf16.mxu0 %v1334_v15 }
  0x83   : > { %1223 = vmatpush3.bf16.msra.mxu1 %v1342_v32 }
  0x84   : > { %1224 = vmatprep.subr.bf16.mxu1 %v1343_v33 }
  0x85   : > { %1183 = vmatpush3.bf16.msra.mxu0 %v1335_v18 }
  0x86   : > { %1184 = vmatprep.subr.bf16.mxu0 %v1336_v20 }
  0x87   : > { %1225 = vmatpush3.bf16.msra.mxu1 %v1343_v33 }
  0x88   : > { %1226 = vmatprep.subr.bf16.mxu1 %v1344_v34 }
  0x89   : > { %1185 = vmatpush3.bf16.msra.mxu0 %v1337_v21 }
  0x8a   : > { %1234 = vmatprep.subr.bf16.mxu0 %v1346_v36 }
  0x8b   : > { %1227 = vmatpush3.bf16.msra.mxu1 %v1344_v34 }
  0x8c   : > { %564 = vmatmul.mubr.bf16.vlgmr.msra.gmra.mrb[0].mxu0 %v392_v26  ;;  %1228 = vmatprep.subr.bf16.mxu1 %v1345_v35  ;;  %v1370_v26 = vld [vmem:[#allocation7 + $0x64] ss:$8 sps:$4 sm:$0xff]  }
  0x8d   : > { %571 = vmatprep.mubr.bf16.mxu0 %v395_v27  ;;  %1235 = vmatpush3.bf16.msra.mxu0 %v1346_v36  ;;  %v1368_v27 = vld [vmem:[#allocation7 + $0x60] ss:$8 sps:$4 sm:$0xff]  }
  0x8e   : > { %1236 = vmatprep.subr.bf16.mxu0 %v1347_v37 }
  0x8f   : > { %1229 = vmatpush3.bf16.msra.mxu1 %v1345_v35 }
  0x90   : > { %921 = vmatprep.subr.bf16.mxu1 %v1352_v0 }
  0x91   : > { %1237 = vmatpush3.bf16.msra.mxu0 %v1347_v37 }
  0x92   : > { %1238 = vmatprep.subr.bf16.mxu0 %v1348_v61 }
  0x94   : > { %572 = vmatmul.mubr.bf16.gmra.mrb[4].mxu0 %v394_v30  ;;  %v1541_v30 = vmov 0  }
  0x95   : > { %1239 = vmatpush3.bf16.msra.mxu0 %v1348_v61 }
  0x96   : > { %1240 = vmatprep.subr.bf16.mxu0 %v1349_v62 }
  0x99   : > { %1241 = vmatpush3.bf16.msra.mxu0 %v1349_v62 }
 0x15f   : > { %v1186_v38 = vpop.f32.mrb[0].mxu0 }
 0x160   : > { %v1187_v39 = vpop.f32.mrb[1].mxu0 }
 0x161   : > { %v1188_v41 = vadd.f32 %v1187_v39, %v1186_v38  ;;  %v1189_v42 = vpop.f32.mrb[2].mxu0 }
 0x162   : > { %v1190_v43 = vpop.f32.mrb[3].mxu0 }
 0x163   : > { %v1191_v44 = vadd.f32 %v1190_v43, %v1189_v42  ;;  %v566_v45 = vadd.f32 %v1188_v41, %v1111_v40 }
 0x165   : > { %v569_v46 = vadd.f32 %v1191_v44, %v1111_v40  ;;  %v580_v48 = vmax.f32 %v566_v45, 0.0 }
 0x167   : > { %v1192_v47 = vpop.f32.mrb[4].mxu0  ;;  %v581_v49 = vmax.f32 %v569_v46, 0.0  ;;  %v831_v46 = vlaneseq }
 0x168   : > { %v1193_v50 = vpop.f32.mrb[5].mxu0 }
 0x169   : > { %v1194_v51 = vadd.f32 %v1193_v50, %v1192_v47  ;;  %v1195_v52 = vpop.f32.mrb[6].mxu0  ;;  %v584_v53 = vpack.c.bf16 %v581_v49, %v580_v48  ;;  %v832_v47 = vshrl.u32 %v831_v46, 7  ;;  %v829_v49 = vld [vmem:[%s1899_s8] sm:$0x3] }
 0x16a   : > { %v1196_v54 = vpop.f32.mrb[7].mxu0 }
 0x16b   : > { %v574_v55 = vadd.f32 %v1194_v51, %v1111_v40  ;;  %v1197_v56 = vadd.f32 %v1196_v54, %v1195_v52  ;;  %1230 = vmatprep.mubr.bf16.mxu1 %v584_v53  ;;  %v833_v48 = vsub.s32 0, %v832_v47  ;;  %v837_v50 = vsub.s32 1, %v832_v47 }
 0x16d   : > { %v577_v57 = vadd.f32 %v1197_v56, %v1111_v40  ;;  %v582_v58 = vmax.f32 %v574_v55, 0.0  ;;  %v834_v51 = vrot.slane %v829_v49, %v833_v48  ;;  %v838_v52 = vrot.slane %v829_v49, %v837_v50 }
 0x16f   : > { %v583_v59 = vmax.f32 %v577_v57, 0.0 }
 0x171   : > { %v585_v60 = vpack.c.bf16 %v583_v59, %v582_v58 }
 0x173   : > { %1231 = vmatmul.mubr.bf16.vlgmr.msra.gmra.mrb[0].mxu1 %v585_v60 }
 0x174   : > { %922 = vmatpush1.bf16.msra.mxu1 %v1350_v63  ;;  %953 = vmatprep.mubr.bf16.mxu1 %v1541_v30 }
 0x175   : > { %923 = vmatprep.subr.bf16.mxu1 %v1355_v1 }
 0x178   : > { %924 = vmatpush1.bf16.msra.mxu1 %v1353_v2 }
 0x179   : > { %925 = vmatprep.subr.bf16.mxu1 %v1358_v3 }
 0x17c   : > { %926 = vmatpush1.bf16.msra.mxu1 %v1356_v4 }
 0x17d   : > { %927 = vmatprep.subr.bf16.mxu1 %v1361_v5 }
 0x180   : > { %928 = vmatpush1.bf16.msra.mxu1 %v1359_v6 }
 0x181   : > { %929 = vmatprep.subr.bf16.mxu1 %v1364_v7 }
 0x184   : > { %930 = vmatpush1.bf16.msra.mxu1 %v1362_v8 }
 0x185   : > { %931 = vmatprep.subr.bf16.mxu1 %v1367_v9 }
 0x188   : > { %932 = vmatpush1.bf16.msra.mxu1 %v1365_v10 }
 0x189   : > { %933 = vmatprep.subr.bf16.mxu1 %v1370_v26 }
 0x18c   : > { %934 = vmatpush1.bf16.msra.mxu1 %v1368_v27 }
 0x18d   : > { %935 = vmatprep.subr.bf16.mxu1 %v1373_v28 }
 0x190   : > { %936 = vmatpush1.bf16.msra.mxu1 %v1371_v29 }
 0x246   : > { %v1232_v12 = vpop.f32.mrb[0].mxu1 }
 0x247   : > { %v700_v13 = vadd.f32 %v1232_v12, %v1128_v11  ;;  %v691_v14 = vpop.f32.mrb[1].mxu1 }
 0x248   : > { %v692_v15 = vadd.f32 %v1128_v11, %v691_v14  ;;  %v1233_v16 = vpop.f32.mrb[2].mxu1 }
 0x249   : > { %v703_v17 = vadd.f32 %v1233_v16, %v1128_v11  ;;  %v694_v18 = vpop.f32.mrb[3].mxu1  ;;  %v708_v20 = vmax.f32 %v700_v13, 0.0 }
 0x24a   : > { %v695_v19 = vadd.f32 %v1128_v11, %v694_v18  ;;  %v706_v22 = vmax.f32 %v692_v15, 0.0 }
 0x24b   : > { %v709_v21 = vmax.f32 %v703_v17, 0.0 }
 0x24c   : > { %v707_v23 = vmax.f32 %v695_v19, 0.0 }
 0x24d   : > { %v711_v24 = vpack.c.bf16 %v709_v21, %v708_v20 }
 0x24e   : > { %v710_v25 = vpack.c.bf16 %v707_v23, %v706_v22 }
 0x250   : > { %1242 = vmatprep.mubr.msk.bf16.mxu0 %vm751_vm0, %v710_v25 }
 0x251   : > { %1243 = vmatmul.mubr.msk.bf16.vlgmr.msra.gmra.mrb[8].mxu0 %vm751_vm0, %v711_v24 }
 0x324   : > { %v1244_v32 = vpop.f32.mrb[8].mxu0 }
 0x325   : > { %v801_v33 = vadd.f32 %v1244_v32, %v1137_v31  ;;  %v792_v34 = vpop.f32.mrb[9].mxu0 }
 0x326   : > { %v793_v35 = vadd.f32 %v1137_v31, %v792_v34  ;;  %v1245_v36 = vpop.f32.mrb[10].mxu0 }
 0x327   : > { %v804_v37 = vadd.f32 %v1245_v36, %v1137_v31  ;;  %v795_v38 = vpop.f32.mrb[11].mxu0  ;;  %v809_v40 = vmax.f32 %v801_v33, 0.0 }
 0x328   : > { %v796_v39 = vadd.f32 %v1137_v31, %v795_v38  ;;  %v807_v42 = vmax.f32 %v793_v35, 0.0 }
 0x329   : > { %v810_v41 = vmax.f32 %v804_v37, 0.0 }
 0x32a   : > { %v808_v43 = vmax.f32 %v796_v39, 0.0 }
 0x32b   : > { %v812_v44 = vpack.c.bf16 %v810_v41, %v809_v40 }
 0x32c   : > { %v811_v45 = vpack.c.bf16 %v808_v43, %v807_v42 }
 0x32e   : > { %954 = vmatmul.mubr.bf16.vlgmr.msra.gmra.mrb[4].mxu1 %v811_v45 }
 0x32f   : > { %963 = vmatprep.mubr.bf16.mxu1 %v1541_v30 }
 0x336   : > { %964 = vmatmul.mubr.bf16.gmra.mrb[8].mxu1 %v812_v44 }
 0x401   : > { %v955_v53 = vpop.f32.mrb[4].mxu1 }
 0x402   : > { %v956_v54 = vadd.f32 %v955_v53, %v834_v51  ;;  %v957_v55 = vpop.f32.mrb[5].mxu1 }
 0x403   : > { %v958_v56 = vadd.f32 %v957_v55, %v838_v52  ;;  %v959_v57 = vpop.f32.mrb[6].mxu1 }
 0x404   : > { %v974_v58 = vmax.f32 %v956_v54, 0.0  ;;  %v960_v59 = vadd.f32 %v959_v57, %v834_v51  ;;  %v961_v60 = vpop.f32.mrb[7].mxu1 }
 0x405   : > { %v975_v61 = vmax.f32 %v958_v56, 0.0  ;;  %v962_v62 = vadd.f32 %v961_v60, %v838_v52 }
 0x406   : > { %982 = vst [vmem:[%s380_s15] sm:$0xff] %v974_v58  ;;  %v976_v63 = vmax.f32 %v960_v59, 0.0 }
 0x407   : > { %983 = vst [vmem:[%s380_s15 + $0x8] sm:$0xff] %v975_v61  ;;  %v977_v0 = vmax.f32 %v962_v62, 0.0 }
 0x408   : > { %984 = vst [vmem:[%s380_s15 + $0x10] sm:$0xff] %v976_v63 }
 0x409   : > { %985 = vst [vmem:[%s380_s15 + $0x18] sm:$0xff] %v977_v0  ;;  %v965_v1 = vpop.f32.mrb[8].mxu1 }
 0x40a   : > { %v966_v2 = vadd.f32 %v965_v1, %v834_v51  ;;  %v967_v3 = vpop.f32.mrb[9].mxu1 }
 0x40b   : > { %v968_v4 = vadd.f32 %v967_v3, %v838_v52  ;;  %v969_v5 = vpop.f32.mrb[10].mxu1 }
 0x40c   : > { %v978_v6 = vmax.f32 %v966_v2, 0.0  ;;  %v970_v7 = vadd.f32 %v969_v5, %v834_v51  ;;  %v971_v8 = vpop.f32.mrb[11].mxu1 }
 0x40d   : > { %v979_v9 = vmax.f32 %v968_v4, 0.0  ;;  %v972_v10 = vadd.f32 %v971_v8, %v838_v52 }
 0x40e   : > { %986 = vst [vmem:[%s380_s15 + $0x20] sm:$0xff] %v978_v6  ;;  %v980_v11 = vmax.f32 %v970_v7, 0.0 }
 0x40f   : > { %987 = vst [vmem:[%s380_s15 + $0x28] sm:$0xff] %v979_v9  ;;  %v981_v12 = vmax.f32 %v972_v10, 0.0 }
 0x410   : > { %988 = vst [vmem:[%s380_s15 + $0x30] sm:$0xff] %v980_v11 }
 0x411   : > { %989 = vst [vmem:[%s380_s15 + $0x38] sm:$0xff] %v981_v12 }
 0x412   : > { %1473 = shalt.err (!%p1470_p2)
}
 0x413   : > { %s1474_s14 = scalar_lea.hbm %s1847_s21, 1024  ;;  %s1478_s22 = scalar_lea.hbm %s1900_s9, 2048 }
 0x414   : > { %p1475_p13 = scmp.ne.s32.totalorder %s1847_s21, %s1474_s14  ;;  %p1479_p4 = scmp.lt.u32.totalorder %s1847_s21, %s1900_s9 }
 0x415   : > { %p1480_p7 = scmp.lt.u32.totalorder %s1478_s22, %s1474_s14  ;;  %p1482_p11 = scmp.lt.u32.totalorder %s1474_s14, %s1847_s21 }
 0x416   : > { %p1476_p6 = pnand %p1475_p13, %p1916_p0 }
 0x417   : > { %p1481_p8 = por %p1480_p7, %p1479_p4 }
 0x418   : > { %p1477_p10 = pneg %p1476_p6 }
 0x419   : > { %p1483_p1 = por %p1482_p11, %p1481_p8 }
 0x41b   : > { %p1484_p3 = pnand %p1483_p1, %p1477_p10 }
 0x41d   : > { %1487 = shalt.err (!%p1484_p3)
}
 0x41e   : > { %s1543_s23 = smov 256   ;;  %s1544_s25 = smov 16  }
 0x41f   : > { %1256 = dma.vmem_to_hbm [thread:$0]  (%p1916_p0), %s1842_s17, 1024, %s1847_s21, %s991_s13, %s1543_s23, %s1543_s23, %s1544_s25  }
 0x420 PF: > { %s1917_s19 = sld [smem:[#allocation12_spill]]  ;;  %s1020_s26 = sand.u32 1, %s1518_s30  }
 0x421   : > { %p1919_p9 = scmp.ge.s32.totalorder %s1530_s12, 2  ;;  %s1021_s14 = scalar_lea.sflag [#allocation4], %s1020_s26 }
 0x426   : > { %p1918_p5 = scmp.ne.s32.totalorder %s1917_s19, 0 }
 0x428   : > { %p1270_p12 = pnand %p1919_p9, %p1918_p5 }
 0x42a   : > { %1513 = dma.done.wait (!%p1270_p12), %s1021_s14, 1024  }
 0x42b   : > { %1515 = vsyncadd (!%p1270_p12), %s1021_s14, 4294966272  ;;  %p23_p2 = scmp.ge.s32.totalorder %s1705_s24, 4   ;;  %s1920_s30 = smov %s1522_s10 }
 0x42c   : > { %s1921_s10 = smov %s1526_s11  ;;  %s1922_s11 = smov %s1714_s27 }
 0x42d   : > { %s1923_s12 = smov %s1705_s24  ;;  %25 = sbr.rel (!%p23_p2) target bundleno = 6 (0x6), region = 109 }
 0x434   :  { %1026 = vsyncpa [#allocation3], 1 }
 0x435   :  { %1028 = vsyncpa [#allocation3 + $0x1], 1 }
 0x436   :  { %1029 = vsyncpa [#allocation6], 1 }
 0x437   :  { %1030 = vsyncpa [#allocation4], 1 }
 0x438   :  { %1032 = vsyncpa [#allocation4 + $0x1], 1 }

</bundles_post_ra>
